<compile_context>
chip_gen: v5e
topology: v5e:2x2
jax: 0.10.0
libtpu: 0.0.40
codegen_flags: <defaults>
</compile_context>

<pallas_src>
import math
import functools

import jax
import jax.numpy as jnp
from jax import lax
from jax.experimental import pallas as pl
from jax.experimental.pallas import tpu as pltpu

_PI = math.pi


def _stenosis_kernel(x_ref, o_ref, *, r, inv_l, scale):
    # x_ref: (11, TS, 128) f32 ; o_ref: (6, TS, 128) f32
    x0 = x_ref[0]
    y_in = x_ref[1]
    z_in = x_ref[2]
    x3 = x_ref[3]
    x4 = x_ref[4]
    A = x_ref[5]
    x6 = x_ref[6]
    s1 = x_ref[7]
    s2 = x_ref[8]
    s3 = x_ref[9]
    s4 = x_ref[10]

    x_r = x0 * inv_l                      # x[...,0] / l
    r0 = 1.0 + x3
    rr = x4 * (x_r * 2.0)
    r0_rr = r0 + rr

    inv_x6 = 1.0 / x6                     # shared between alpha and denom_exp
    t = x_r * inv_x6
    alpha = -0.5 * (t * t)                # -(x_r/x6)^2 / 2, exact squaring

    # Trig: only sin/cos(pi*x); 2*pi*x terms via double-angle identities.
    sin_pix = jnp.sin(_PI * x_r)
    cos_pix = jnp.cos(_PI * x_r)
    sin_2pix = 2.0 * sin_pix * cos_pix
    cos_2pix = 1.0 - 2.0 * (sin_pix * sin_pix)

    cline_y = r * (s1 * sin_pix + s2 * sin_2pix)
    cline_z = r * (s3 * sin_pix + s4 * sin_2pix)

    one_m_Aexp = 1.0 - A * jnp.exp(alpha)
    radius_y = y_in * r0_rr * one_m_Aexp
    radius_z = z_in * r0_rr * one_m_Aexp

    # -0.25 * (1/x6)^2 / 2  ==  -0.125 * inv_x6^2
    denom_exp = 1.0 - A * jnp.exp(-0.125 * (inv_x6 * inv_x6))
    ar = (r0_rr * one_m_Aexp) / ((r0 - x4) * denom_exp)   # merged divide
    area_ratio = ar * ar                                   # exact square

    cline_dydx = scale * (s1 * cos_pix + 2.0 * s2 * cos_2pix)
    cline_dzdx = scale * (s3 * cos_pix + 2.0 * s4 * cos_2pix)

    norm_y = lax.rsqrt(cline_dydx * cline_dydx + 1.0)
    norm_xy = -norm_y * cline_dydx
    norm_z = lax.rsqrt(cline_dzdx * cline_dzdx + 1.0)
    norm_xz = -norm_z * cline_dzdx

    o_ref[0] = x0 + norm_xy * radius_y + norm_xz * radius_z
    o_ref[1] = cline_y + norm_y * radius_y
    o_ref[2] = cline_z + norm_z * radius_z
    o_ref[3] = cline_dydx
    o_ref[4] = cline_dzdx
    o_ref[5] = area_ratio


def stenosis_forward(x, r, l, *, tile_rows=512):
    """x: (..., 11) float32.  Returns (..., 6) float32.

    tile_rows: sublane rows of 128 lanes per grid step (multiple of 8).
    Default 512 rows -> 65536 points/tile (~9 MB double-buffered), which
    fits comfortably inside the 32 MiB scoped VMEM limit on all of
    v5e / v6e / v7x.
    """
    assert x.shape[-1] == 11, "Stenosis expects 11 input features"
    orig_shape = x.shape
    n = math.prod(orig_shape[:-1]) if len(orig_shape) > 1 else 1

    r_f = float(r)
    l_f = float(l)
    inv_l = 1.0 / l_f
    scale = r_f * _PI / l_f

    xf = x.reshape(n, 11).astype(jnp.float32)

    # Choose tiling: rows of 128 lanes, tile must be a multiple of 8 rows.
    rows = max(1, -(-n // 128))
    rows8 = ((rows + 7) // 8) * 8
    ts = max(8, (min(int(tile_rows), rows8) // 8) * 8)
    rows_pad = ((rows8 + ts - 1) // ts) * ts
    # Prefer >= 2 grid steps (v7x has 2 TensorCores sharded over "parallel").
    if rows_pad // ts < 2 and rows_pad >= 16 and rows_pad % 16 == 0:
        ts = rows_pad // 2
    n_pad = rows_pad * 128

    # Pad at the (N, 11) stage (cheap), ones avoid div-by-zero in pad lanes.
    if n_pad != n:
        xf = jnp.pad(xf, ((0, n_pad - n), (0, 0)), constant_values=1.0)

    # Feature-major, lane-dense layout: (11, rows_pad, 128).
    xt = xf.T.reshape(11, rows_pad, 128)

    grid = (rows_pad // ts,)
    out_t = pl.pallas_call(
        functools.partial(_stenosis_kernel, r=r_f, inv_l=inv_l, scale=scale),
        out_shape=jax.ShapeDtypeStruct((6, rows_pad, 128), jnp.float32),
        grid_spec=pltpu.PrefetchScalarGridSpec(
            num_scalar_prefetch=0,
            grid=grid,
            in_specs=[pl.BlockSpec((11, ts, 128), lambda i: (0, i, 0))],
            out_specs=pl.BlockSpec((6, ts, 128), lambda i: (0, i, 0)),
        ),
        compiler_params=pltpu.CompilerParams(
            dimension_semantics=("parallel",),
            vmem_limit_bytes=32 * 1024 * 1024,
        ),
    )(xt)

    out = out_t.reshape(6, n_pad)[:, :n].T  # (N, 6)
    return out.reshape(orig_shape[:-1] + (6,))


def _stenosis_reference(x, r, l):
    """Pure-JAX reference mirroring the PyTorch forward exactly."""
    x_ref = x[..., 0:1] / l
    y_ref = x[..., 1:2]
    z_ref = x[..., 2:3]
    r0 = 1 + x[..., 3:4]
    rr = x[..., 4:5] * x_ref * 2.0
    A = x[..., 5:6]
    alpha = -1.0 * (x_ref / x[..., 6:7]) ** 2.0 / 2.0
    s1 = x[..., 7:8]
    s2 = x[..., 8:9]
    s3 = x[..., 9:10]
    s4 = x[..., 10:11]
    cline_y = r * (s1 * jnp.sin(_PI * x_ref) + s2 * jnp.sin(2.0 * _PI * x_ref))
    cline_z = r * (s3 * jnp.sin(_PI * x_ref) + s4 * jnp.sin(2.0 * _PI * x_ref))
    radius_y = y_ref * (r0 + rr) * (1.0 - A * jnp.exp(alpha))
    radius_z = z_ref * (r0 + rr) * (1.0 - A * jnp.exp(alpha))
    area_ratio = ((r0 + rr) / (r0 - x[..., 4:5])
                  * (1.0 - A * jnp.exp(alpha))
                  / (1.0 - A * jnp.exp(-0.25 * (1.0 / x[..., 6:7]) ** 2.0 / 2.0))) ** 2.0
    cline_dydx = r * _PI / l * (s1 * jnp.cos(_PI * x_ref) + 2.0 * s2 * jnp.cos(2.0 * _PI * x_ref))
    cline_dzdx = r * _PI / l * (s3 * jnp.cos(_PI * x_ref) + 2.0 * s4 * jnp.cos(2.0 * _PI * x_ref))
    norm_y = 1.0 / jnp.sqrt(cline_dydx ** 2.0 + 1.0)
    norm_xy = -norm_y * cline_dydx
    norm_z = 1.0 / jnp.sqrt(cline_dzdx ** 2.0 + 1.0)
    norm_xz = -norm_z * cline_dzdx
    return jnp.concatenate(
        (x[..., 0:1] + norm_xy * radius_y + norm_xz * radius_z,
         cline_y + norm_y * radius_y,
         cline_z + norm_z * radius_z,
         cline_dydx, cline_dzdx, area_ratio), -1)


if __name__ == "__main__":
    # Deterministic "buffers" (module __init__ args r, l)
    R = 0.5
    L = 2.0

    key = jax.random.PRNGKey(0)
    # small geometry-parameter point cloud: (batch=2, points=100, features=11)
    x = jax.random.uniform(key, (2, 100, 11), jnp.float32, minval=0.1, maxval=0.9)

    out = stenosis_forward(x, R, L)
    out = jax.block_until_ready(out)

    ref = _stenosis_reference(x, jnp.float32(R), jnp.float32(L))
    assert out.shape == (2, 100, 6), out.shape
    assert jnp.allclose(out, ref, rtol=1e-5, atol=1e-5), float(jnp.max(jnp.abs(out - ref)))

    print("KERNEL_OK")
</pallas_src>

<mosaic_0001>
module attributes {stable_mosaic.version = 11 : i64} {
  func.func @_stenosis_kernel(%arg0: i32, %arg1: memref<11x8x128xf32, #tpu.memory_space<vmem>>, %arg2: memref<6x8x128xf32, #tpu.memory_space<vmem>>) attributes {dimension_semantics = [#tpu.dimension_semantics<parallel>], iteration_bounds = array<i64: 1>, scalar_prefetch = 0 : i64, scratch_operands = 0 : i64, tpu.core_type = #tpu.core_type<tc>, window_params = [{transform_indices = @transform_0, window_bounds = array<i64: 11, 8, 128>}, {transform_indices = @transform_1, window_bounds = array<i64: 6, 8, 128>}]} {
    %c0 = arith.constant 0 : index
    %c0_0 = arith.constant 0 : index
    %c0_1 = arith.constant 0 : index
    %0 = vector.load %arg1[%c0, %c0_0, %c0_1] : memref<11x8x128xf32, #tpu.memory_space<vmem>>, vector<1x8x128xf32>
    %1 = vector.shape_cast %0 : vector<1x8x128xf32> to vector<8x128xf32>
    %c1 = arith.constant 1 : index
    %c0_2 = arith.constant 0 : index
    %c0_3 = arith.constant 0 : index
    %2 = vector.load %arg1[%c1, %c0_2, %c0_3] : memref<11x8x128xf32, #tpu.memory_space<vmem>>, vector<1x8x128xf32>
    %3 = vector.shape_cast %2 : vector<1x8x128xf32> to vector<8x128xf32>
    %c2 = arith.constant 2 : index
    %c0_4 = arith.constant 0 : index
    %c0_5 = arith.constant 0 : index
    %4 = vector.load %arg1[%c2, %c0_4, %c0_5] : memref<11x8x128xf32, #tpu.memory_space<vmem>>, vector<1x8x128xf32>
    %5 = vector.shape_cast %4 : vector<1x8x128xf32> to vector<8x128xf32>
    %c3 = arith.constant 3 : index
    %c0_6 = arith.constant 0 : index
    %c0_7 = arith.constant 0 : index
    %6 = vector.load %arg1[%c3, %c0_6, %c0_7] : memref<11x8x128xf32, #tpu.memory_space<vmem>>, vector<1x8x128xf32>
    %7 = vector.shape_cast %6 : vector<1x8x128xf32> to vector<8x128xf32>
    %c4 = arith.constant 4 : index
    %c0_8 = arith.constant 0 : index
    %c0_9 = arith.constant 0 : index
    %8 = vector.load %arg1[%c4, %c0_8, %c0_9] : memref<11x8x128xf32, #tpu.memory_space<vmem>>, vector<1x8x128xf32>
    %9 = vector.shape_cast %8 : vector<1x8x128xf32> to vector<8x128xf32>
    %c5 = arith.constant 5 : index
    %c0_10 = arith.constant 0 : index
    %c0_11 = arith.constant 0 : index
    %10 = vector.load %arg1[%c5, %c0_10, %c0_11] : memref<11x8x128xf32, #tpu.memory_space<vmem>>, vector<1x8x128xf32>
    %11 = vector.shape_cast %10 : vector<1x8x128xf32> to vector<8x128xf32>
    %c6 = arith.constant 6 : index
    %c0_12 = arith.constant 0 : index
    %c0_13 = arith.constant 0 : index
    %12 = vector.load %arg1[%c6, %c0_12, %c0_13] : memref<11x8x128xf32, #tpu.memory_space<vmem>>, vector<1x8x128xf32>
    %13 = vector.shape_cast %12 : vector<1x8x128xf32> to vector<8x128xf32>
    %c7 = arith.constant 7 : index
    %c0_14 = arith.constant 0 : index
    %c0_15 = arith.constant 0 : index
    %14 = vector.load %arg1[%c7, %c0_14, %c0_15] : memref<11x8x128xf32, #tpu.memory_space<vmem>>, vector<1x8x128xf32>
    %15 = vector.shape_cast %14 : vector<1x8x128xf32> to vector<8x128xf32>
    %c8 = arith.constant 8 : index
    %c0_16 = arith.constant 0 : index
    %c0_17 = arith.constant 0 : index
    %16 = vector.load %arg1[%c8, %c0_16, %c0_17] : memref<11x8x128xf32, #tpu.memory_space<vmem>>, vector<1x8x128xf32>
    %17 = vector.shape_cast %16 : vector<1x8x128xf32> to vector<8x128xf32>
    %c9 = arith.constant 9 : index
    %c0_18 = arith.constant 0 : index
    %c0_19 = arith.constant 0 : index
    %18 = vector.load %arg1[%c9, %c0_18, %c0_19] : memref<11x8x128xf32, #tpu.memory_space<vmem>>, vector<1x8x128xf32>
    %19 = vector.shape_cast %18 : vector<1x8x128xf32> to vector<8x128xf32>
    %c10 = arith.constant 10 : index
    %c0_20 = arith.constant 0 : index
    %c0_21 = arith.constant 0 : index
    %20 = vector.load %arg1[%c10, %c0_20, %c0_21] : memref<11x8x128xf32, #tpu.memory_space<vmem>>, vector<1x8x128xf32>
    %21 = vector.shape_cast %20 : vector<1x8x128xf32> to vector<8x128xf32>
    %cst = arith.constant 5.000000e-01 : f32
    %22 = vector.broadcast %cst : f32 to vector<8x128xf32>
    %23 = arith.mulf %1, %22 : vector<8x128xf32>
    %cst_22 = arith.constant 1.000000e+00 : f32
    %24 = vector.broadcast %cst_22 : f32 to vector<8x128xf32>
    %25 = arith.addf %24, %7 : vector<8x128xf32>
    %cst_23 = arith.constant 2.000000e+00 : f32
    %26 = vector.broadcast %cst_23 : f32 to vector<8x128xf32>
    %27 = arith.mulf %23, %26 : vector<8x128xf32>
    %28 = arith.mulf %9, %27 : vector<8x128xf32>
    %29 = arith.addf %25, %28 : vector<8x128xf32>
    %cst_24 = arith.constant 1.000000e+00 : f32
    %30 = vector.broadcast %cst_24 : f32 to vector<8x128xf32>
    %31 = arith.divf %30, %13 : vector<8x128xf32>
    %32 = arith.mulf %23, %31 : vector<8x128xf32>
    %33 = arith.mulf %32, %32 : vector<8x128xf32>
    %cst_25 = arith.constant -5.000000e-01 : f32
    %34 = vector.broadcast %cst_25 : f32 to vector<8x128xf32>
    %35 = arith.mulf %34, %33 : vector<8x128xf32>
    %cst_26 = arith.constant 3.14159274 : f32
    %36 = vector.broadcast %cst_26 : f32 to vector<8x128xf32>
    %37 = arith.mulf %36, %23 : vector<8x128xf32>
    %38 = math.sin %37 : vector<8x128xf32>
    %cst_27 = arith.constant 3.14159274 : f32
    %39 = vector.broadcast %cst_27 : f32 to vector<8x128xf32>
    %40 = arith.mulf %39, %23 : vector<8x128xf32>
    %41 = math.cos %40 : vector<8x128xf32>
    %cst_28 = arith.constant 2.000000e+00 : f32
    %42 = vector.broadcast %cst_28 : f32 to vector<8x128xf32>
    %43 = arith.mulf %42, %38 : vector<8x128xf32>
    %44 = arith.mulf %43, %41 : vector<8x128xf32>
    %45 = arith.mulf %38, %38 : vector<8x128xf32>
    %cst_29 = arith.constant 2.000000e+00 : f32
    %46 = vector.broadcast %cst_29 : f32 to vector<8x128xf32>
    %47 = arith.mulf %46, %45 : vector<8x128xf32>
    %cst_30 = arith.constant 1.000000e+00 : f32
    %48 = vector.broadcast %cst_30 : f32 to vector<8x128xf32>
    %49 = arith.subf %48, %47 : vector<8x128xf32>
    %50 = arith.mulf %15, %38 : vector<8x128xf32>
    %51 = arith.mulf %17, %44 : vector<8x128xf32>
    %52 = arith.addf %50, %51 : vector<8x128xf32>
    %cst_31 = arith.constant 5.000000e-01 : f32
    %53 = vector.broadcast %cst_31 : f32 to vector<8x128xf32>
    %54 = arith.mulf %53, %52 : vector<8x128xf32>
    %55 = arith.mulf %19, %38 : vector<8x128xf32>
    %56 = arith.mulf %21, %44 : vector<8x128xf32>
    %57 = arith.addf %55, %56 : vector<8x128xf32>
    %cst_32 = arith.constant 5.000000e-01 : f32
    %58 = vector.broadcast %cst_32 : f32 to vector<8x128xf32>
    %59 = arith.mulf %58, %57 : vector<8x128xf32>
    %60 = math.exp %35 : vector<8x128xf32>
    %61 = arith.mulf %11, %60 : vector<8x128xf32>
    %cst_33 = arith.constant 1.000000e+00 : f32
    %62 = vector.broadcast %cst_33 : f32 to vector<8x128xf32>
    %63 = arith.subf %62, %61 : vector<8x128xf32>
    %64 = arith.mulf %3, %29 : vector<8x128xf32>
    %65 = arith.mulf %64, %63 : vector<8x128xf32>
    %66 = arith.mulf %5, %29 : vector<8x128xf32>
    %67 = arith.mulf %66, %63 : vector<8x128xf32>
    %68 = arith.mulf %31, %31 : vector<8x128xf32>
    %cst_34 = arith.constant -1.250000e-01 : f32
    %69 = vector.broadcast %cst_34 : f32 to vector<8x128xf32>
    %70 = arith.mulf %69, %68 : vector<8x128xf32>
    %71 = math.exp %70 : vector<8x128xf32>
    %72 = arith.mulf %11, %71 : vector<8x128xf32>
    %cst_35 = arith.constant 1.000000e+00 : f32
    %73 = vector.broadcast %cst_35 : f32 to vector<8x128xf32>
    %74 = arith.subf %73, %72 : vector<8x128xf32>
    %75 = arith.mulf %29, %63 : vector<8x128xf32>
    %76 = arith.subf %25, %9 : vector<8x128xf32>
    %77 = arith.mulf %76, %74 : vector<8x128xf32>
    %78 = arith.divf %75, %77 : vector<8x128xf32>
    %79 = arith.mulf %78, %78 : vector<8x128xf32>
    %80 = arith.mulf %15, %41 : vector<8x128xf32>
    %cst_36 = arith.constant 2.000000e+00 : f32
    %81 = vector.broadcast %cst_36 : f32 to vector<8x128xf32>
    %82 = arith.mulf %81, %17 : vector<8x128xf32>
    %83 = arith.mulf %82, %49 : vector<8x128xf32>
    %84 = arith.addf %80, %83 : vector<8x128xf32>
    %cst_37 = arith.constant 0.785398185 : f32
    %85 = vector.broadcast %cst_37 : f32 to vector<8x128xf32>
    %86 = arith.mulf %85, %84 : vector<8x128xf32>
    %87 = arith.mulf %19, %41 : vector<8x128xf32>
    %cst_38 = arith.constant 2.000000e+00 : f32
    %88 = vector.broadcast %cst_38 : f32 to vector<8x128xf32>
    %89 = arith.mulf %88, %21 : vector<8x128xf32>
    %90 = arith.mulf %89, %49 : vector<8x128xf32>
    %91 = arith.addf %87, %90 : vector<8x128xf32>
    %cst_39 = arith.constant 0.785398185 : f32
    %92 = vector.broadcast %cst_39 : f32 to vector<8x128xf32>
    %93 = arith.mulf %92, %91 : vector<8x128xf32>
    %94 = arith.mulf %86, %86 : vector<8x128xf32>
    %cst_40 = arith.constant 1.000000e+00 : f32
    %95 = vector.broadcast %cst_40 : f32 to vector<8x128xf32>
    %96 = arith.addf %94, %95 : vector<8x128xf32>
    %97 = math.rsqrt %96 : vector<8x128xf32>
    %cst_41 = arith.constant 0.000000e+00 : f32
    %98 = vector.broadcast %cst_41 : f32 to vector<8x128xf32>
    %99 = arith.subf %98, %97 : vector<8x128xf32>
    %100 = arith.mulf %99, %86 : vector<8x128xf32>
    %101 = arith.mulf %93, %93 : vector<8x128xf32>
    %cst_42 = arith.constant 1.000000e+00 : f32
    %102 = vector.broadcast %cst_42 : f32 to vector<8x128xf32>
    %103 = arith.addf %101, %102 : vector<8x128xf32>
    %104 = math.rsqrt %103 : vector<8x128xf32>
    %cst_43 = arith.constant 0.000000e+00 : f32
    %105 = vector.broadcast %cst_43 : f32 to vector<8x128xf32>
    %106 = arith.subf %105, %104 : vector<8x128xf32>
    %107 = arith.mulf %106, %93 : vector<8x128xf32>
    %108 = arith.mulf %100, %65 : vector<8x128xf32>
    %109 = arith.addf %1, %108 : vector<8x128xf32>
    %110 = arith.mulf %107, %67 : vector<8x128xf32>
    %111 = arith.addf %109, %110 : vector<8x128xf32>
    %c0_44 = arith.constant 0 : index
    %c0_45 = arith.constant 0 : index
    %c0_46 = arith.constant 0 : index
    %112 = vector.load %arg2[%c0_44, %c0_45, %c0_46] : memref<6x8x128xf32, #tpu.memory_space<vmem>>, vector<1x8x128xf32>
    %113 = vector.shape_cast %112 : vector<1x8x128xf32> to vector<8x128xf32>
    %114 = vector.shape_cast %111 : vector<8x128xf32> to vector<1x8x128xf32>
    tpu.vector_store %arg2[%c0_44, %c0_45, %c0_46], %114 {strides = array<i32>} : memref<6x8x128xf32, #tpu.memory_space<vmem>>, vector<1x8x128xf32>,
    %115 = arith.mulf %97, %65 : vector<8x128xf32>
    %116 = arith.addf %54, %115 : vector<8x128xf32>
    %c1_47 = arith.constant 1 : index
    %c0_48 = arith.constant 0 : index
    %c0_49 = arith.constant 0 : index
    %117 = vector.load %arg2[%c1_47, %c0_48, %c0_49] : memref<6x8x128xf32, #tpu.memory_space<vmem>>, vector<1x8x128xf32>
    %118 = vector.shape_cast %117 : vector<1x8x128xf32> to vector<8x128xf32>
    %119 = vector.shape_cast %116 : vector<8x128xf32> to vector<1x8x128xf32>
    tpu.vector_store %arg2[%c1_47, %c0_48, %c0_49], %119 {strides = array<i32>} : memref<6x8x128xf32, #tpu.memory_space<vmem>>, vector<1x8x128xf32>,
    %120 = arith.mulf %104, %67 : vector<8x128xf32>
    %121 = arith.addf %59, %120 : vector<8x128xf32>
    %c2_50 = arith.constant 2 : index
    %c0_51 = arith.constant 0 : index
    %c0_52 = arith.constant 0 : index
    %122 = vector.load %arg2[%c2_50, %c0_51, %c0_52] : memref<6x8x128xf32, #tpu.memory_space<vmem>>, vector<1x8x128xf32>
    %123 = vector.shape_cast %122 : vector<1x8x128xf32> to vector<8x128xf32>
    %124 = vector.shape_cast %121 : vector<8x128xf32> to vector<1x8x128xf32>
    tpu.vector_store %arg2[%c2_50, %c0_51, %c0_52], %124 {strides = array<i32>} : memref<6x8x128xf32, #tpu.memory_space<vmem>>, vector<1x8x128xf32>,
    %c3_53 = arith.constant 3 : index
    %c0_54 = arith.constant 0 : index
    %c0_55 = arith.constant 0 : index
    %125 = vector.load %arg2[%c3_53, %c0_54, %c0_55] : memref<6x8x128xf32, #tpu.memory_space<vmem>>, vector<1x8x128xf32>
    %126 = vector.shape_cast %125 : vector<1x8x128xf32> to vector<8x128xf32>
    %127 = vector.shape_cast %86 : vector<8x128xf32> to vector<1x8x128xf32>
    tpu.vector_store %arg2[%c3_53, %c0_54, %c0_55], %127 {strides = array<i32>} : memref<6x8x128xf32, #tpu.memory_space<vmem>>, vector<1x8x128xf32>,
    %c4_56 = arith.constant 4 : index
    %c0_57 = arith.constant 0 : index
    %c0_58 = arith.constant 0 : index
    %128 = vector.load %arg2[%c4_56, %c0_57, %c0_58] : memref<6x8x128xf32, #tpu.memory_space<vmem>>, vector<1x8x128xf32>
    %129 = vector.shape_cast %128 : vector<1x8x128xf32> to vector<8x128xf32>
    %130 = vector.shape_cast %93 : vector<8x128xf32> to vector<1x8x128xf32>
    tpu.vector_store %arg2[%c4_56, %c0_57, %c0_58], %130 {strides = array<i32>} : memref<6x8x128xf32, #tpu.memory_space<vmem>>, vector<1x8x128xf32>,
    %c5_59 = arith.constant 5 : index
    %c0_60 = arith.constant 0 : index
    %c0_61 = arith.constant 0 : index
    %131 = vector.load %arg2[%c5_59, %c0_60, %c0_61] : memref<6x8x128xf32, #tpu.memory_space<vmem>>, vector<1x8x128xf32>
    %132 = vector.shape_cast %131 : vector<1x8x128xf32> to vector<8x128xf32>
    %133 = vector.shape_cast %79 : vector<8x128xf32> to vector<1x8x128xf32>
    tpu.vector_store %arg2[%c5_59, %c0_60, %c0_61], %133 {strides = array<i32>} : memref<6x8x128xf32, #tpu.memory_space<vmem>>, vector<1x8x128xf32>,
    return
  }
  func.func @transform_0(%arg0: i32) -> (i32, i32, i32) {
    %c0_i32 = arith.constant 0 : i32
    %c0_i32_0 = arith.constant 0 : i32
    %c0_i32_1 = arith.constant 0 : i32
    return %c0_i32, %arg0, %c0_i32_0 : i32, i32, i32
  }
  func.func @transform_1(%arg0: i32) -> (i32, i32, i32) {
    %c0_i32 = arith.constant 0 : i32
    %c0_i32_0 = arith.constant 0 : i32
    %c0_i32_1 = arith.constant 0 : i32
    return %c0_i32, %arg0, %c0_i32_0 : i32, i32, i32
  }
}

</mosaic_0001>

<bundles_post_ra>
// kernel: tpu_custom_call.1
= control target key start
LH: loop header
LB: loop body
LE: loop exit
PB: predicated region body
PF: predicated region fallthrough
CT: control target
= control target key end

     0   :  { %6 = vsyncpa [#allocation3], 0  ;;  %s670_s0 = inlined_call_operand.hbm [shape: f32[11,8,128], index: 0, kind: input, shape index: {}]   ;;  %s671_s1 = inlined_call_operand.hbm [shape: f32[6,8,128], index: 1, kind: output, shape index: {}]  }
   0x1   :  { %7 = vsyncpa [#allocation4], 0  ;;  %s12_s8 = sshll.u32 %s670_s0, 4  ;;  %s582_s9 = smov [#allocation2]   ;;  %s13_s8 = int_to_ptr.hbm [resolvable:$true] %s12_s8 }
   0x2   :  { %s14_s10 = sshll.u32 %s582_s9, 4  ;;  %s583_s11 = smov 128   ;;  %s15_s10 = int_to_ptr.vmem [resolvable:$true] %s14_s10 }
   0x3   :  { %s584_s12 = smov 8  }
   0x4   :  { %20 = dma.hbm_to_vmem [thread:$0]  %s13_s8, 1408, %s15_s10, [#allocation3], %s583_s11, %s583_s11, %s584_s12  }
   0x5   :  { %578 = dma.done.wait [#allocation3], 1408  }
   0x6   :  { %579 = vsyncadd [#allocation3], 4294965888  ;;  %v609_v0 = vld [vmem:[#allocation2] sm:$0xff]  ;;  %v585_v14 = vmov 683565275   ;;  %s592_s0 = smov [#allocation5]  }
   0x7   :  { %v612_v1 = vmul.f32 0.5, %v609_v0  ;;  %v586_v16 = vmov 2475754826   ;;  %v587_v18 = vmov 2131351028   ;;  %s486_s13 = sshll.u32 %s592_s0, 4  ;;  %s487_s13 = int_to_ptr.vmem [resolvable:$true] %s486_s13 }
   0x8   :  { %v588_v20 = vmov 2102212464   ;;  %v589_v22 = vmov 920167782   ;;  %v590_v28 = vmov 1326507024  }
   0x9   :  { %v615_v2 = vmul.f32 3.1415927, %v612_v1  ;;  %s488_s16 = sshll.u32 %s671_s1, 4  ;;  %s489_s16 = int_to_ptr.hbm [resolvable:$true] %s488_s16 }
   0xb   :  { %v73_v3 = vand.u32 2139095040, %v615_v2  ;;  %v70_v5 = vand.u32 2147483647, %v615_v2 }
   0xd   :  { %v74_v4 = vshrl.u32 %v73_v3, 23  ;;  %v77_v8 = vand.u32 8388607, %v70_v5 }
   0xf   :  { %v501_v6 = vadd.s32 4294967169, %v74_v4  ;;  %v78_v12 = vor.u32 8388608, %v77_v8 }
  0x11   :  { %v80_v7 = vadd.s32 1, %v501_v6  ;;  %v624_v32 = vshll.u32 %v78_v12, 8  ;;  %v591_v6 = vmov 0  }
  0x13   :  { %vm81_vm0 = vcmp.gt.s32.totalorder %v80_v7, 0  ;;  %v119_v42 = vand.u32 65535, %v624_v32  ;;  %v120_v43 = vshrl.u32 %v624_v32, 16 }
  0x14   :  { %v82_v9 = vsel %vm81_vm0, %v80_v7, 0  ;;  %vm72_vm0 = vcmp.lt.s32.totalorder %v615_v2, 0 }
  0x15   :  { %v84_v10 = vand.u32 31, %v82_v9  ;;  %v621_v11 = vshrl.u32 %v82_v9, 5 }
  0x17   :  { %v85_v13 = vsub.s32 32, %v84_v10  ;;  %v87_v15 = vshll.u32 %v585_v14, %v84_v10  ;;  %v90_v17 = vshll.u32 %v586_v16, %v84_v10  ;;  %v93_v19 = vshll.u32 %v587_v18, %v84_v10 }
  0x18   :  { %v96_v21 = vshll.u32 %v588_v20, %v84_v10  ;;  %v99_v23 = vshll.u32 %v589_v22, %v84_v10  ;;  %vm102_vm1 = vcmp.lt.s32.totalorder %v621_v11, 1  ;;  %vm104_vm2 = vcmp.lt.s32.totalorder %v621_v11, 3 }
  0x19   :  { %v88_v24 = vshrl.u32 %v586_v16, %v85_v13  ;;  %v91_v25 = vshrl.u32 %v587_v18, %v85_v13  ;;  %v94_v26 = vshrl.u32 %v588_v20, %v85_v13  ;;  %v97_v27 = vshrl.u32 %v589_v22, %v85_v13 }
  0x1a   :  { %v100_v29 = vshrl.u32 %v590_v28, %v85_v13  ;;  %vm103_vm3 = vcmp.lt.s32.totalorder %v621_v11, 2  ;;  %vm105_vm4 = vcmp.lt.s32.totalorder %v621_v11, 4  ;;  %v86_v50 = vshrl.u32 %v585_v14, %v85_v13 }
  0x1b   :  { %v89_v30 = vor.u32 %v88_v24, %v87_v15  ;;  %v92_v31 = vor.u32 %v91_v25, %v90_v17  ;;  %v95_v33 = vor.u32 %v94_v26, %v93_v19  ;;  %v98_v34 = vor.u32 %v97_v27, %v96_v21  ;;  %v37_v26 = vld [vmem:[#allocation2 + $0x30] sm:$0xff] }
  0x1c   :  { %v101_v35 = vor.u32 %v100_v29, %v99_v23  ;;  %518 = vrcp.f32 %v37_v26  ;;  %vm56_vm11 = vweird.f32 %v37_v26 }
  0x1d   :  { %v110_v36 = vsel %vm102_vm1, %v89_v30, %v92_v31  ;;  %v111_v37 = vsel %vm105_vm4, %v98_v34, 920167782  ;;  %v114_v38 = vsel %vm102_vm1, %v92_v31, %v95_v33  ;;  %v106_v63 = vsel %vm102_vm1, %v86_v50, %v89_v30 }
  0x1e   :  { %v115_v39 = vsel %vm105_vm4, %v101_v35, 1326507024  ;;  %v112_v40 = vsel %vm104_vm2, %v95_v33, %v111_v37  ;;  %v107_v4 = vsel %vm105_vm4, %v95_v33, 2102212464  ;;  %vm71_vm1 = vcmp.le.f32.partialorder %v70_v5, 0.7853982 }
  0x1f   :  { %v116_v41 = vsel %vm104_vm2, %v98_v34, %v115_v39  ;;  %v113_v44 = vsel %vm103_vm3, %v110_v36, %v112_v40  ;;  %v108_v16 = vsel %vm104_vm2, %v92_v31, %v107_v4 }
  0x20   :  { %v117_v45 = vsel %vm103_vm3, %v114_v38, %v116_v41  ;;  %v143_v48 = vand.u32 65535, %v113_v44  ;;  %v144_v49 = vshrl.u32 %v113_v44, 16  ;;  %v109_v24 = vsel %vm103_vm3, %v106_v63, %v108_v16 }
  0x21   :  { %v121_v46 = vand.u32 65535, %v117_v45  ;;  %v122_v47 = vshrl.u32 %v117_v45, 16  ;;  %v163_v29 = vmul.u32 %v624_v32, %v109_v24  ;;  %v62_v32 = vand.u32 2147483648, %v37_v26 }
  0x22   :  { %v145_v54 = vmul.u32 %v143_v48, %v119_v42  ;;  %v146_v55 = vmul.u32 %v144_v49, %v119_v42  ;;  %v147_v56 = vmul.u32 %v143_v48, %v120_v43  ;;  %v148_v60 = vmul.u32 %v144_v49, %v120_v43  ;;  %v519_v35 = vpop.eup %518 }
  0x23   :  { %v123_v51 = vmul.u32 %v121_v46, %v119_v42  ;;  %v124_v52 = vmul.u32 %v122_v47, %v119_v42  ;;  %v125_v53 = vmul.u32 %v121_v46, %v120_v43  ;;  %v126_v57 = vmul.u32 %v122_v47, %v120_v43 }
  0x24   :  { %v149_v61 = vshll.u32 %v146_v55, 16  ;;  %v151_v62 = vshll.u32 %v147_v56, 16  ;;  %v150_v14 = vshrl.u32 %v146_v55, 16  ;;  %v152_v20 = vshrl.u32 %v147_v56, 16 }
  0x25   :  { %v127_v58 = vshll.u32 %v124_v52, 16  ;;  %v129_v59 = vshll.u32 %v125_v53, 16  ;;  %v128_v9 = vshrl.u32 %v124_v52, 16  ;;  %v130_v17 = vshrl.u32 %v125_v53, 16 }
  0x26   :  { %vm153_vm6 = vc.u32 %v145_v54, %v149_v61  ;;  %v155_v8 = vadd.s32 %v149_v61, %v145_v54  ;;  %v52_v37 = vmul.f32 %v519_v35, %v37_v26  ;;  %vm57_vm12 = vweird.f32 %v519_v35 }
  0x27   :  { %vm131_vm5 = vc.u32 %v123_v51, %v127_v58  ;;  %v133_v3 = vadd.s32 %v127_v58, %v123_v51  ;;  %v154_v12 = vsel %vm153_vm6, 1, %v591_v6  ;;  %v60_v47 = vand.u32 2147483647, %v37_v26  ;;  %vm58_vm14 = vmor %vm56_vm11, %vm57_vm12 }
  0x28   :  { %v132_v7 = vsel %vm131_vm5, 1, %v591_v6  ;;  %v156_v15 = vadd.s32 %v154_v12, %v148_v60  ;;  %vm157_vm8 = vc.u32 %v155_v8, %v151_v62  ;;  %v159_v23 = vadd.s32 %v155_v8, %v151_v62 }
  0x29   :  { %v134_v10 = vadd.s32 %v132_v7, %v126_v57  ;;  %vm135_vm7 = vc.u32 %v133_v3, %v129_v59  ;;  %v158_v19 = vsel %vm157_vm8, 1, %v591_v6  ;;  %v53_v40 = vsub.f32 1.0, %v52_v37 }
  0x2a   :  { %v136_v13 = vsel %vm135_vm7, 1, %v591_v6  ;;  %v160_v21 = vadd.s32 %v158_v19, %v156_v15  ;;  %v63_v52 = vor.u32 1.1754944e-38, %v62_v32  ;;  %vm61_vm15 = vcmp.eq.f32.partialorder %v60_v47, 8.507059e+37  ;;  %v33_v19 = vld [vmem:[#allocation2 + $0x20] sm:$0xff] }
  0x2b   :  { %v138_v18 = vadd.s32 %v136_v13, %v134_v10  ;;  %v54_v43 = vmul.f32 %v519_v35, %v53_v40  ;;  %v31_v13 = vld [vmem:[#allocation2 + $0x18] sm:$0xff]  ;;  %vm213_vm8 = vweird.f32 %v615_v2 }
  0x2c   :  { %v161_v25 = vadd.s32 %v160_v21, %v150_v14  ;;  %v35_v21 = vld [vmem:[#allocation2 + $0x28] sm:$0xff] }
  0x2d   :  { %v139_v22 = vadd.s32 %v138_v18, %v128_v9  ;;  %v55_v46 = vadd.f32 %v519_v35, %v54_v43 }
  0x2e   :  { %v162_v28 = vadd.s32 %v161_v25, %v152_v20  ;;  %v47_v20 = vadd.f32 1.0, %v31_v13 }
  0x2f   :  { %v140_v27 = vadd.s32 %v139_v22, %v130_v17  ;;  %v59_v55 = vsel %vm58_vm14, %v519_v35, %v55_v46 }
  0x30   :  { %v166_v30 = vadd.s32 1, %v162_v28  ;;  %v64_v58 = vsel %vm61_vm15, %v63_v52, %v59_v55  ;;  %v41_v52 = vld [vmem:[#allocation2 + $0x40] sm:$0xff] }
  0x31   :  { %vm165_vm9 = vc.u32 %v140_v27, %v159_v23  ;;  %v164_v45 = vadd.s32 %v159_v23, %v140_v27  ;;  %v400_v62 = vmul.f32 %v64_v58, %v64_v58  ;;  %v66_v6 = vmul.f32 %v64_v58, %v612_v1  ;;  %v39_v58 = vld [vmem:[#allocation2 + $0x38] sm:$0xff] }
  0x32   :  { %v167_v31 = vsel %vm165_vm9, %v166_v30, %v162_v28 }
  0x33   :  { %v168_v33 = vadd.s32 %v167_v31, %v163_v29  ;;  %v401_v4 = vmul.f32 -0.125, %v400_v62  ;;  %v67_v14 = vmul.f32 %v66_v6, %v66_v6  ;;  %v407_v29 = vsub.f32 %v47_v20, %v33_v19 }
  0x35   :  { %v169_v34 = vadd.s32 536870912, %v168_v33  ;;  %v402_v8 = vmul.f32 1.442695, %v401_v4  ;;  %v68_v22 = vmul.f32 -0.5, %v67_v14 }
  0x37   :  { %v170_v36 = vshrl.u32 %v169_v34, 30  ;;  %520 = vpow2.f32 %v402_v8 }
  0x39   :  { %v171_v38 = vshll.u32 %v170_v36, 30  ;;  %v194_v3 = vsub.s32 4, %v170_v36 }
  0x3b   :  { %v172_v39 = vsub.s32 %v168_v33, %v171_v38  ;;  %v195_v10 = vsel %vm72_vm0, %v194_v3, %v170_v36  ;;  %v392_v33 = vmul.f32 1.442695, %v68_v22 }
  0x3c   :  { %v197_v16 = vsel %vm71_vm1, 0, %v195_v10 }
  0x3d   :  { %vm173_vm10 = vcmp.lt.s32.totalorder %v172_v39, 0  ;;  %v174_v11 = vsub.s32 0, %v172_v39  ;;  %v521_v5 = vpop.eup %520  ;;  %v214_v25 = vadd.s32 3, %v197_v16  ;;  %v369_v35 = vand.u32 3, %v197_v16 }
  0x3e   :  { %v404_v28 = vmul.f32 %v521_v5, %v35_v21  ;;  %522 = vpow2.f32 %v392_v33 }
  0x3f   :  { %v175_v41 = vsel %vm173_vm10, %v174_v11, %v172_v39  ;;  %v215_v34 = vand.u32 3, %v214_v25  ;;  %vm374_vm3 = vcmp.eq.s32.totalorder %v369_v35, 2  ;;  %vm371_vm6 = vcmp.eq.s32.totalorder %v369_v35, 0 }
  0x40   :  { %v176_v42 = vclz %v175_v41  ;;  %v405_v36 = vsub.f32 1.0, %v404_v28  ;;  %vm370_vm7 = vcmp.lt.s32.totalorder %v369_v35, 2 }
  0x41   :  { %vm220_vm2 = vcmp.eq.s32.totalorder %v215_v34, 2  ;;  %vm216_vm4 = vcmp.lt.s32.totalorder %v215_v34, 2  ;;  %vm217_vm5 = vcmp.eq.s32.totalorder %v215_v34, 0  ;;  %v27_v34 = vld [vmem:[#allocation2 + $0x8] sm:$0xff] }
  0x42   :  { %v502_v44 = vadd.s32 4294967294, %v176_v42 }
  0x44   :  { %vm503_vm13 = vcmp.lt.s32.totalorder %v502_v44, 0  ;;  %v523_v46 = vpop.eup %522 }
  0x45   :  { %v179_v48 = vsel %vm503_vm13, 0, %v502_v44 }
  0x46   :  { %v180_v49 = vsub.s32 32, %v179_v48  ;;  %v181_v50 = vshll.u32 %v172_v39, %v179_v48  ;;  %v184_v51 = vsub.s32 4294967266, %v179_v48  ;;  %v408_v39 = vmul.f32 %v407_v29, %v405_v36  ;;  %v29_v36 = vld [vmem:[#allocation2 + $0x10] sm:$0xff] }
  0x48   :  { %v182_v53 = vshrl.u32 %v164_v45, %v180_v49  ;;  %v185_v54 = vadd.s32 127, %v184_v51  ;;  %524 = vrcp.f32 %v408_v39  ;;  %v48_v45 = vmul.f32 2.0, %v612_v1 }
  0x49   :  { %v420_v4 = vand.u32 2147483648, %v408_v39  ;;  %vm414_vm9 = vweird.f32 %v408_v39 }
  0x4a   :  { %v183_v56 = vor.u32 %v182_v53, %v181_v50  ;;  %v186_v57 = vshll.u32 %v185_v54, 23  ;;  %v45_v53 = vld [vmem:[#allocation2 + $0x50] sm:$0xff] }
  0x4c   :  { %v187_v59 = vor.u32 4788187, %v186_v57  ;;  %v190_v60 = vcvt.s32.f32 %v183_v56  ;;  %v49_v56 = vmul.f32 %v48_v45, %v33_v19 }
  0x4e   :  { %v188_v61 = vand.u32 2147483647, %v187_v59  ;;  %v525_v49 = vpop.eup %524  ;;  %v43_v59 = vld [vmem:[#allocation2 + $0x48] sm:$0xff]  ;;  %v50_v6 = vadd.f32 %v49_v56, %v47_v20 }
  0x4f   :  { %v410_v55 = vmul.f32 %v525_v49, %v408_v39  ;;  %vm415_vm10 = vweird.f32 %v525_v49 }
  0x50   :  { %v191_v63 = vmul.f32 %v190_v60, %v188_v61  ;;  %v394_v61 = vmul.f32 %v523_v46, %v35_v21  ;;  %vm416_vm11 = vmor %vm414_vm9, %vm415_vm10 }
  0x51   :  { %v411_v62 = vsub.f32 1.0, %v410_v55 }
  0x52   :  { %v192_v7 = vxor.u32 2147483648, %v191_v63  ;;  %v395_v10 = vsub.f32 1.0, %v394_v61 }
  0x53   :  { %v412_v3 = vmul.f32 %v525_v49, %v411_v62 }
  0x54   :  { %v193_v9 = vsel %vm72_vm0, %v192_v7, %v191_v63  ;;  %v426_v63 = vmul.f32 2.0, %v41_v52 }
  0x55   :  { %v196_v12 = vsel %vm71_vm1, %v615_v2, %v193_v9  ;;  %v431_v2 = vmul.f32 2.0, %v45_v53 }
  0x56   :  { %v198_v15 = vmul.f32 %v196_v12, %v196_v12 }
  0x58   :  { %v199_v17 = vmul.f32 -0.001358992, %v198_v15  ;;  %v206_v18 = vmul.f32 -0.00019511016, %v198_v15 }
  0x5a   :  { %v200_v23 = vadd.f32 0.041655596, %v199_v17  ;;  %v207_v24 = vadd.f32 0.008332121, %v206_v18  ;;  %v418_v17 = vand.u32 2147483647, %v408_v39 }
  0x5b   :  { %v421_v18 = vor.u32 1.1754944e-38, %v420_v4 }
  0x5c   :  { %v201_v26 = vmul.f32 %v200_v23, %v198_v15  ;;  %v208_v27 = vmul.f32 %v207_v24, %v198_v15  ;;  %vm419_vm12 = vcmp.eq.f32.partialorder %v418_v17, 8.507059e+37 }
  0x5e   :  { %v202_v30 = vadd.f32 -0.4999988, %v201_v26  ;;  %v209_v31 = vadd.f32 -0.16666654, %v208_v27 }
  0x60   :  { %v203_v37 = vmul.f32 %v202_v30, %v198_v15  ;;  %v210_v38 = vmul.f32 %v209_v31, %v198_v15  ;;  %v406_v15 = vmul.f32 %v395_v10, %v50_v6 }
  0x62   :  { %v204_v40 = vadd.f32 1.0, %v203_v37  ;;  %v211_v11 = vadd.f32 1.0, %v210_v38 }
  0x64   :  { %v212_v41 = vmul.f32 %v211_v11, %v196_v12  ;;  %v221_v42 = vxor.u32 2147483648, %v204_v40  ;;  %v413_v12 = vadd.f32 %v525_v49, %v412_v3 }
  0x66   :  { %v218_v43 = vxor.u32 2147483648, %v212_v41  ;;  %v222_v44 = vsel %vm220_vm2, %v221_v42, %v212_v41  ;;  %v376_v32 = vsel %vm374_vm3, %v221_v42, %v212_v41  ;;  %v417_v16 = vsel %vm416_vm11, %v525_v49, %v413_v12 }
  0x67   :  { %v422_v20 = vsel %vm419_vm12, %v421_v18, %v417_v16  ;;  %v396_v42 = vmul.f32 %v50_v6, %v27_v34 }
  0x68   :  { %v219_v47 = vsel %vm217_vm5, %v204_v40, %v218_v43  ;;  %v373_v48 = vsel %vm371_vm6, %v204_v40, %v218_v43  ;;  %v423_v24 = vmul.f32 %v422_v20, %v406_v15 }
  0x69   :  { %v223_v50 = vsel %vm216_vm4, %v219_v47, %v222_v44  ;;  %v377_v51 = vsel %vm370_vm7, %v373_v48, %v376_v32  ;;  %v398_v44 = vmul.f32 %v50_v6, %v29_v36 }
  0x6a   :  { %v224_v54 = vsel %vm213_vm8, nan, %v223_v50  ;;  %v378_v60 = vsel %vm213_vm8, nan, %v377_v51  ;;  %v424_v26 = vmul.f32 %v423_v24, %v423_v24 }
  0x6b   :  { %v381_v57 = vmul.f32 %v224_v54, %v224_v54  ;;  %v425_v8 = vmul.f32 %v378_v60, %v39_v58  ;;  %v430_v9 = vmul.f32 %v378_v60, %v43_v59  ;;  %v379_v29 = vmul.f32 2.0, %v224_v54 }
  0x6c   :  { %481 = vst [vmem:[#allocation5 + $0x28] sm:$0xff] %v424_v26  ;;  %v384_v38 = vmul.f32 %v224_v54, %v39_v58  ;;  %v388_v11 = vmul.f32 %v224_v54, %v43_v59  ;;  %v399_v50 = vmul.f32 %v398_v44, %v395_v10 }
  0x6d   :  { %v382_v1 = vmul.f32 2.0, %v381_v57  ;;  %v380_v30 = vmul.f32 %v379_v29, %v378_v60 }
  0x6f   :  { %v383_v7 = vsub.f32 1.0, %v382_v1  ;;  %v385_v39 = vmul.f32 %v380_v30, %v41_v52  ;;  %v389_v41 = vmul.f32 %v380_v30, %v45_v53  ;;  %v397_v52 = vmul.f32 %v396_v42, %v395_v10 }
  0x71   :  { %v427_v13 = vmul.f32 %v426_v63, %v383_v7  ;;  %v432_v14 = vmul.f32 %v431_v2, %v383_v7  ;;  %v386_v46 = vadd.f32 %v385_v39, %v384_v38  ;;  %v390_v48 = vadd.f32 %v389_v41, %v388_v11 }
  0x73   :  { %v428_v19 = vadd.f32 %v427_v13, %v425_v8  ;;  %v433_v21 = vadd.f32 %v432_v14, %v430_v9  ;;  %v387_v53 = vmul.f32 0.5, %v386_v46  ;;  %v391_v56 = vmul.f32 0.5, %v390_v48 }
  0x75   :  { %v429_v22 = vmul.f32 0.7853982, %v428_v19  ;;  %v434_v23 = vmul.f32 0.7853982, %v433_v21 }
  0x77   :  { %v435_v5 = vmul.f32 %v429_v22, %v429_v22  ;;  %v449_v25 = vmul.f32 %v434_v23, %v434_v23  ;;  %477 = vst [vmem:[#allocation5 + $0x18] sm:$0xff] %v429_v22 }
  0x78   :  { %479 = vst [vmem:[#allocation5 + $0x20] sm:$0xff] %v434_v23 }
  0x79   :  { %v436_v27 = vadd.f32 1.0, %v435_v5  ;;  %v450_v28 = vadd.f32 1.0, %v449_v25 }
  0x7b   :  { %526 = vrsqrt.f32 %v436_v27  ;;  %vm443_vm13 = vweird.f32 %v436_v27  ;;  %vm457_vm15 = vweird.f32 %v450_v28 }
  0x7c   :  { %528 = vrsqrt.f32 %v450_v28 }
  0x81   :  { %v527_v31 = vpop.eup %526 }
  0x82   :  { %v529_v33 = vpop.eup %528  ;;  %v438_v35 = vmul.f32 %v527_v31, %v436_v27  ;;  %vm444_vm14 = vweird.f32 %v527_v31 }
  0x83   :  { %v452_v37 = vmul.f32 %v529_v33, %v450_v28  ;;  %vm458_vm0 = vweird.f32 %v529_v33  ;;  %vm445_vm1 = vmor %vm443_vm13, %vm444_vm14 }
  0x84   :  { %v439_v40 = vmul.f32 %v527_v31, %v438_v35  ;;  %vm459_vm2 = vmor %vm457_vm15, %vm458_vm0 }
  0x85   :  { %v453_v43 = vmul.f32 %v529_v33, %v452_v37 }
  0x86   :  { %v440_v32 = vmul.f32 0.5, %v439_v40 }
  0x87   :  { %v454_v45 = vmul.f32 0.5, %v453_v43 }
  0x88   :  { %v441_v47 = vsub.f32 1.5, %v440_v32 }
  0x89   :  { %v455_v49 = vsub.f32 1.5, %v454_v45 }
  0x8a   :  { %v442_v51 = vmul.f32 %v527_v31, %v441_v47 }
  0x8b   :  { %v456_v54 = vmul.f32 %v529_v33, %v455_v49 }
  0x8c   :  { %v446_v55 = vsel %vm445_vm1, %v527_v31, %v442_v51 }
  0x8d   :  { %v447_v57 = vsub.f32 0.0, %v446_v55  ;;  %v460_v58 = vsel %vm459_vm2, %v529_v33, %v456_v54  ;;  %v468_v59 = vmul.f32 %v446_v55, %v397_v52 }
  0x8e   :  { %v461_v60 = vsub.f32 0.0, %v460_v58  ;;  %v472_v61 = vmul.f32 %v460_v58, %v399_v50 }
  0x8f   :  { %v448_v62 = vmul.f32 %v447_v57, %v429_v22  ;;  %v469_v1 = vadd.f32 %v468_v59, %v387_v53 }
  0x90   :  { %v462_v63 = vmul.f32 %v461_v60, %v434_v23  ;;  %v473_v2 = vadd.f32 %v472_v61, %v391_v56 }
  0x91   :  { %v463_v3 = vmul.f32 %v448_v62, %v397_v52  ;;  %471 = vst [vmem:[#allocation5 + $0x8] sm:$0xff] %v469_v1 }
  0x92   :  { %v465_v4 = vmul.f32 %v462_v63, %v399_v50  ;;  %475 = vst [vmem:[#allocation5 + $0x10] sm:$0xff] %v473_v2 }
  0x93   :  { %v464_v6 = vadd.f32 %v463_v3, %v609_v0 }
  0x95   :  { %v466_v7 = vadd.f32 %v465_v4, %v464_v6 }
  0x97   :  { %467 = vst [vmem:[#allocation5] sm:$0xff] %v466_v7 }
  0x98   :  { %494 = dma.vmem_to_hbm [thread:$0]  %s487_s13, 768, %s489_s16, [#allocation4], %s583_s11, %s583_s11, %s584_s12  }
  0x99   :  { %580 = dma.done.wait [#allocation4], 768  }
  0x9a   :  { %581 = vsyncadd [#allocation4], 4294966528 }
  0x9b   :  { %499 = vsyncpa [#allocation3], 1 }
  0x9c   :  { %500 = vsyncpa [#allocation4], 1 }

</bundles_post_ra>
